<compile_context>
chip_gen: v7x
topology: tpu7x:2x2x1
jax: 0.10.0
libtpu: 0.0.40
codegen_flags: <defaults>
</compile_context>

<pallas_src>
import numpy as np
import jax
import jax.numpy as jnp
from jax.experimental import pallas as pl
from jax.experimental.pallas import tpu as pltpu  # noqa: F401  (kept for TPU-specific tuning hooks)


# ---------------------------------------------------------------------------
# Wavelet_Intra as a dense linear operator along the node axis (host-side glue)
# ---------------------------------------------------------------------------

# pywt.Wavelet('coif1').dec_lo  (analysis low-pass, 6 taps, sums to sqrt(2))
COIF1_DEC_LO = np.array(
    [
        -0.01565572813546454,
        -0.0727326195128539,
        0.38486484686420286,
        0.8525720202122554,
        0.3378976624578092,
        -0.0727326195128539,
    ],
    dtype=np.float64,
)


def _sym_ext(x, n):
    # pywt 'symmetric' (half-sample) extension
    return np.concatenate([x[:n][::-1], x, x[-n:][::-1]])


def _dwt1(x, flt):
    # single-level DWT channel, matches pywt dwt (mode='symmetric')
    F = len(flt)
    N = len(x)
    xe = _sym_ext(x, F - 1)
    L = (N + F - 1) // 2
    idx = F + 2 * np.arange(L)
    return np.convolve(xe, flt)[idx]


def _idwt1(cA, cD, rec_lo, rec_hi):
    # single-level IDWT, matches pywt idwt (output length 2L - F + 2)
    F = len(rec_lo)
    L = len(cA)
    upA = np.zeros(2 * L)
    upD = np.zeros(2 * L)
    upA[::2] = cA
    upD[::2] = cD
    y = np.convolve(upA, rec_lo) + np.convolve(upD, rec_hi)
    return y[F - 2 : F - 2 + 2 * L - F + 2]


def wavelet_intra_matrix(n_nodes):
    """(N, N) matrix M s.t. Wavelet_Intra(x) along the node axis == M @ x_nodes."""
    assert n_nodes % 2 == 0, "waverec output length only matches the input for even N"
    dec_lo = COIF1_DEC_LO
    F = len(dec_lo)
    dec_hi = np.array([(-1.0) ** (k + 1) * dec_lo[F - 1 - k] for k in range(F)])
    rec_lo = dec_lo[::-1].copy()
    rec_hi = dec_hi[::-1].copy()

    eye = np.eye(n_nodes, dtype=np.float64)
    M = np.zeros((n_nodes, n_nodes), dtype=np.float64)
    M_pr = np.zeros((n_nodes, n_nodes), dtype=np.float64)  # perfect-reconstruction check
    for c in range(n_nodes):
        e = eye[:, c]
        cA = _dwt1(e, dec_lo)
        cD = _dwt1(e, dec_hi)
        M[:, c] = _idwt1(2.0 * cA, cD, rec_lo, rec_hi)[:n_nodes]   # coef_intra = [2*cA, cD]
        M_pr[:, c] = _idwt1(cA, cD, rec_lo, rec_hi)[:n_nodes]
    # sanity: un-scaled recon must be the identity (validates DWT/IDWT conventions)
    assert np.allclose(M_pr, eye, atol=1e-10), "wavelet perfect-reconstruction failed"
    return M


def wavelet_intra_kron(M_np, seq_len):
    """Host-built (N*S, N*S) operator applying M along the node axis of the
    node-major / seq-minor flattened lane dimension (done once, outside jit)."""
    # TODO(synk): for large S, reorder lanes seq-major and tile kron(I_S, M^T)
    # block-diagonally per 128-lane chunk so VMEM stays O(N^2) (critical on v7x,
    # 64 MiB physical / 32 MiB default scoped VMEM).
    return np.kron(M_np.T, np.eye(seq_len, dtype=M_np.dtype))


# ---------------------------------------------------------------------------
# Fused Pallas kernel: wavelet node-mix -> Linear1 -> ReLU -> Linear2 -> ReLU
# ---------------------------------------------------------------------------

def encoder_intra_kernel(x_ref, g_ref, w1_ref, b1_ref, w2_ref, b2_ref, o_ref):
    # x_ref : (B*D, NS)  batch-major on sublanes; lanes = node*seq (node-major)
    # g_ref : (NS, NS)   wavelet node-mixing operator  G = kron(M^T, I_S)
    # w1_ref: (B*H, B*D) block-diagonal kron(I_B, W1^T)
    # b1_ref: (B*H, 1)   float32
    # w2_ref: (B*H, B*H) block-diagonal kron(I_B, W2^T)
    # b2_ref: (B*H, 1)   float32
    # o_ref : (B*H, NS)  float32
    #
    # Wavelet first (only B*D = 8 rows -> cheapest place for the kron matmul);
    # it acts purely along lanes so it commutes with the feature-axis Linears.
    xw = jnp.dot(x_ref[...], g_ref[...], preferred_element_type=jnp.float32)      # (B*D, NS)
    # Linear1 (block-diag over batch) + bias + ReLU; elementwise stays float32.
    z = jnp.dot(w1_ref[...], xw.astype(w1_ref.dtype),
                preferred_element_type=jnp.float32)                               # (B*H, NS)
    h = jnp.maximum(z + b1_ref[...], 0.0)
    # Linear2 + bias + ReLU.
    out = jnp.dot(w2_ref[...], h.astype(w2_ref.dtype),
                  preferred_element_type=jnp.float32) + b2_ref[...]
    o_ref[...] = jnp.maximum(out, 0.0)


def encoder_intra(x, G, W1, b1, W2, b2, compute_dtype=jnp.bfloat16):
    """x: (B, N, S, D) -> (B, N, S, H).  Semantics of Encoder_Intra.forward with
    the module defaults (num_layers=2, dropout_rate=0.0, use_batchnorm=False).
    G is the host-precomputed (N*S, N*S) operator kron(M^T, I_S)."""
    B, N, S, D = x.shape
    H = W1.shape[1]
    NS = N * S

    # Layout: rows = batch-major/feature-minor (B*D), lanes = node-major/seq-minor.
    x2d = jnp.transpose(x, (0, 3, 1, 2)).reshape(B * D, NS)

    # Block-diagonal weights so the whole batch runs as one matmul (tiny kron).
    eye_b = jnp.eye(B, dtype=W1.dtype)
    w1bd = jnp.kron(eye_b, W1.T)                                   # (B*H, B*D)
    w2bd = jnp.kron(eye_b, W2.T)                                   # (B*H, B*H)
    b1t = jnp.tile(b1, B).reshape(B * H, 1).astype(jnp.float32)    # (B*H, 1)
    b2t = jnp.tile(b2, B).reshape(B * H, 1).astype(jnp.float32)    # (B*H, 1)

    out2d = pl.pallas_call(
        encoder_intra_kernel,
        out_shape=jax.ShapeDtypeStruct((B * H, NS), jnp.float32),
        # No grid / BlockSpecs: every (tiny) operand lives whole in VMEM for the
        # single fused invocation.  For large B reintroduce a ("parallel",) batch
        # grid; for large S switch to the S-tiled block-diagonal wavelet operator.
    )(
        x2d.astype(compute_dtype),
        G.astype(compute_dtype),
        w1bd.astype(compute_dtype),
        b1t,
        w2bd.astype(compute_dtype),
        b2t,
    )

    # TODO(synk): skip this relayout if the downstream consumer accepts (B, H, N*S).
    return jnp.transpose(out2d.reshape(B, H, N, S), (0, 2, 3, 1))


# ---------------------------------------------------------------------------
# Driver
# ---------------------------------------------------------------------------

if __name__ == "__main__":
    # (batch, num_of_node, seq_len, input_dim); hidden_dim = 32
    B, N, S, D, H = 2, 16, 8, 4, 32

    M_np = wavelet_intra_matrix(N)
    M = jnp.asarray(M_np, dtype=jnp.float32)
    G = jnp.asarray(wavelet_intra_kron(M_np, S), dtype=jnp.float32)   # host-built, once

    key = jax.random.PRNGKey(0)
    kx, k1, k2, k3, k4 = jax.random.split(key, 5)
    x = jax.random.normal(kx, (B, N, S, D), dtype=jnp.float32)

    # nn.Linear-style init (uniform +/- 1/sqrt(fan_in)); stored as (in, out)
    lim1 = 1.0 / np.sqrt(D)
    W1 = jax.random.uniform(k1, (D, H), minval=-lim1, maxval=lim1, dtype=jnp.float32)
    b1 = jax.random.uniform(k2, (H,), minval=-lim1, maxval=lim1, dtype=jnp.float32)
    lim2 = 1.0 / np.sqrt(H)
    W2 = jax.random.uniform(k3, (H, H), minval=-lim2, maxval=lim2, dtype=jnp.float32)
    b2 = jax.random.uniform(k4, (H,), minval=-lim2, maxval=lim2, dtype=jnp.float32)

    fwd_bf16 = jax.jit(lambda *a: encoder_intra(*a, compute_dtype=jnp.bfloat16))
    fwd_f32 = jax.jit(lambda *a: encoder_intra(*a, compute_dtype=jnp.float32))

    out_bf16 = jax.block_until_ready(fwd_bf16(x, G, W1, b1, W2, b2))
    out_f32 = jax.block_until_ready(fwd_f32(x, G, W1, b1, W2, b2))
    assert out_bf16.shape == (B, N, S, H) and out_bf16.dtype == jnp.float32
    assert out_f32.shape == (B, N, S, H) and out_f32.dtype == jnp.float32

    # pure-JAX reference (wavelet applied first, exactly as the PyTorch module does)
    ref = jnp.einsum("nm,bmsd->bnsd", M, x)
    ref = jnp.maximum(jnp.einsum("bnsd,dh->bnsh", ref, W1) + b1, 0.0)
    ref = jnp.maximum(jnp.einsum("bnsh,hk->bnsk", ref, W2) + b2, 0.0)
    ref = np.asarray(ref)

    # f32 operand path: bit-level-tight check of the fused kernel structure.
    assert np.allclose(np.asarray(out_f32), ref, rtol=1e-4, atol=1e-4)
    # bf16 MXU operands with f32 accumulation: looser tolerance as advised.
    assert np.allclose(np.asarray(out_bf16), ref, rtol=5e-2, atol=5e-2)

    print("KERNEL_OK")
</pallas_src>

<mosaic_0001>
module attributes {stable_mosaic.version = 11 : i64} {
  func.func @encoder_intra_kernel(%arg0: memref<8x128xbf16, #tpu.memory_space<vmem>>, %arg1: memref<128x128xbf16, #tpu.memory_space<vmem>>, %arg2: memref<64x8xbf16, #tpu.memory_space<vmem>>, %arg3: memref<64x1xf32, #tpu.memory_space<vmem>>, %arg4: memref<64x64xbf16, #tpu.memory_space<vmem>>, %arg5: memref<64x1xf32, #tpu.memory_space<vmem>>, %arg6: memref<64x128xf32, #tpu.memory_space<vmem>>) attributes {dimension_semantics = [], scalar_prefetch = 0 : i64, scratch_operands = 0 : i64, tpu.core_type = #tpu.core_type<tc>} {
    %c0 = arith.constant 0 : index
    %c0_0 = arith.constant 0 : index
    %0 = vector.load %arg0[%c0, %c0_0] : memref<8x128xbf16, #tpu.memory_space<vmem>>, vector<8x128xbf16>
    %c0_1 = arith.constant 0 : index
    %c0_2 = arith.constant 0 : index
    %1 = vector.load %arg1[%c0_1, %c0_2] : memref<128x128xbf16, #tpu.memory_space<vmem>>, vector<128x128xbf16>
    %cst = arith.constant dense<0.000000e+00> : vector<8x128xf32>
    %2 = tpu.matmul %0, %1, %cst {dimension_numbers = #tpu.dot_dimension_numbers<[1], [0], [0], [1], [0, 0, 1, 1], [], []>} : vector<8x128xbf16>, vector<128x128xbf16>, vector<8x128xf32> -> vector<8x128xf32>
    %c0_3 = arith.constant 0 : index
    %c0_4 = arith.constant 0 : index
    %3 = vector.load %arg2[%c0_3, %c0_4] : memref<64x8xbf16, #tpu.memory_space<vmem>>, vector<64x8xbf16>
    %4 = arith.truncf %2 : vector<8x128xf32> to vector<8x128xbf16>
    %cst_5 = arith.constant dense<0.000000e+00> : vector<64x128xf32>
    %5 = tpu.matmul %3, %4, %cst_5 {dimension_numbers = #tpu.dot_dimension_numbers<[1], [0], [0], [1], [0, 0, 1, 1], [], []>} : vector<64x8xbf16>, vector<8x128xbf16>, vector<64x128xf32> -> vector<64x128xf32>
    %c0_6 = arith.constant 0 : index
    %c0_7 = arith.constant 0 : index
    %6 = vector.load %arg3[%c0_6, %c0_7] : memref<64x1xf32, #tpu.memory_space<vmem>>, vector<64x1xf32>
    %7 = vector.broadcast %6 : vector<64x1xf32> to vector<64x128xf32>
    %8 = arith.addf %5, %7 : vector<64x128xf32>
    %cst_8 = arith.constant 0.000000e+00 : f32
    %9 = vector.broadcast %cst_8 : f32 to vector<64x128xf32>
    %10 = arith.maximumf %8, %9 : vector<64x128xf32>
    %c0_9 = arith.constant 0 : index
    %c0_10 = arith.constant 0 : index
    %11 = vector.load %arg4[%c0_9, %c0_10] : memref<64x64xbf16, #tpu.memory_space<vmem>>, vector<64x64xbf16>
    %12 = arith.truncf %10 : vector<64x128xf32> to vector<64x128xbf16>
    %cst_11 = arith.constant dense<0.000000e+00> : vector<64x128xf32>
    %13 = tpu.matmul %11, %12, %cst_11 {dimension_numbers = #tpu.dot_dimension_numbers<[1], [0], [0], [1], [0, 0, 1, 1], [], []>} : vector<64x64xbf16>, vector<64x128xbf16>, vector<64x128xf32> -> vector<64x128xf32>
    %c0_12 = arith.constant 0 : index
    %c0_13 = arith.constant 0 : index
    %14 = vector.load %arg5[%c0_12, %c0_13] : memref<64x1xf32, #tpu.memory_space<vmem>>, vector<64x1xf32>
    %15 = vector.broadcast %14 : vector<64x1xf32> to vector<64x128xf32>
    %16 = arith.addf %13, %15 : vector<64x128xf32>
    %cst_14 = arith.constant 0.000000e+00 : f32
    %17 = vector.broadcast %cst_14 : f32 to vector<64x128xf32>
    %18 = arith.maximumf %16, %17 : vector<64x128xf32>
    %c0_15 = arith.constant 0 : index
    %c0_16 = arith.constant 0 : index
    %19 = vector.load %arg6[%c0_15, %c0_16] : memref<64x128xf32, #tpu.memory_space<vmem>>, vector<64x128xf32>
    tpu.vector_store %arg6[%c0_15, %c0_16], %18 {strides = array<i32>} : memref<64x128xf32, #tpu.memory_space<vmem>>, vector<64x128xf32>,
    return
  }
}

</mosaic_0001>

<bundles_post_ra>
// kernel: tile.13
= control target key start
LH: loop header
LB: loop body
LE: loop exit
PB: predicated region body
PF: predicated region fallthrough
CT: control target
= control target key end

     0   :  { %s22_s0 = inlined_call_operand.vmem [shape: f32[32], index: 0, kind: input, shape index: {}]   ;;  %s23_s1 = inlined_call_operand.vmem [shape: f32[2,32], index: 1, kind: output, shape index: {}]  }
   0x1   :  { %v4_v0 = vld [vmem:[%s22_s0] ss:$0 sm:$0xff] }
   0x2   :  { %5 = vst [vmem:[%s23_s1] sm:$0x3] %v4_v0 }

// kernel: tile.1
= control target key start
LH: loop header
LB: loop body
LE: loop exit
PB: predicated region body
PF: predicated region fallthrough
CT: control target
= control target key end

     0   :  { %s354_s8 = smov 125   ;;  %s355_s9 = smov 126   ;;  %vm7_vm0 = vcmask 7168   ;;  %s653_s0 = inlined_call_operand.vmem [shape: f32[2,32], index: 0, kind: input, shape index: {}]   ;;  %s654_s1 = inlined_call_operand.vmem [shape: f32[64,1], index: 1, kind: output, shape index: {}]  }
   0x1   :  { %v4_v0 = vld [vmem:[%s653_s0] sm:$0x3]  ;;  %s353_s0 = smov 127   ;;  %s356_s10 = smov 124  }
   0x2   :  { %5 = vst [vmem:[#allocation0] sm:$0x3] %v4_v0  ;;  %s357_s11 = smov 123   ;;  %s358_s12 = smov 122  }
   0x3   :  { %s359_s13 = smov 121   ;;  %s360_s14 = smov 120  }
   0x4   :  { %s361_s15 = smov 119   ;;  %s362_s16 = smov 118  }
   0x5   :  { %s363_s17 = smov 117   ;;  %s364_s18 = smov 116  }
   0x6   :  { %s365_s19 = smov 115   ;;  %s366_s20 = smov 114  }
   0x7   :  { %s367_s21 = smov 113   ;;  %s368_s22 = smov 112  }
   0x8   :  { %s369_s23 = smov 111   ;;  %s370_s24 = smov 110  }
   0x9   :  { %v11_v1 = vld [vmem:[#allocation0] sm:$0x3]   ;;  %s371_s25 = smov 109   ;;  %s372_s26 = smov 108  }
   0xa   :  { %v27_v2 = vld [vmem:[#allocation0] sm:$0x3]   ;;  %12 = vrot.lane.b32.xlu0 %v11_v1, %s353_s0  ;;  %s373_s27 = smov 107   ;;  %s374_s28 = smov 106  }
   0xb   :  { %28 = vrot.lane.b32.xlu1 %v27_v2, %s354_s8  ;;  %v19_v3 = vld [vmem:[#allocation0] sm:$0x3]   ;;  %s375_s29 = smov 105   ;;  %s376_s30 = smov 104  }
   0xc   :  { %v35_v4 = vld [vmem:[#allocation0] sm:$0x3]   ;;  %s377_s6 = smov 103   ;;  %s378_s7 = smov 102  }
   0xd   :  { %v43_v5 = vld [vmem:[#allocation0] sm:$0x3]   ;;  %s379_s0 = smov 101   ;;  %s380_s8 = smov 100  }
   0xe   :  { %20 = vrot.lane.b32.xlu0 %v19_v3, %s355_s9  ;;  %v51_v6 = vld [vmem:[#allocation0] sm:$0x3]   ;;  %s381_s9 = smov 99  }
   0xf   :  { %36 = vrot.lane.b32.xlu1 %v35_v4, %s356_s10  ;;  %v59_v7 = vld [vmem:[#allocation0] sm:$0x3]   ;;  %s382_s10 = smov 98  }
  0x10   :  { %v67_v8 = vld [vmem:[#allocation0] sm:$0x3]  }
  0x11   :  { %v75_v9 = vld [vmem:[#allocation0] sm:$0x3]  }
  0x12   :  { %44 = vrot.lane.b32.xlu0 %v43_v5, %s357_s11  ;;  %v83_v10 = vld [vmem:[#allocation0] sm:$0x3]   ;;  %s383_s11 = smov 97  }
  0x13   :  { %52 = vrot.lane.b32.xlu1 %v51_v6, %s358_s12  ;;  %v91_v11 = vld [vmem:[#allocation0] sm:$0x3]  }
  0x14   :  { %v99_v12 = vld [vmem:[#allocation0] sm:$0x3]  }
  0x15   :  { %v107_v13 = vld [vmem:[#allocation0] sm:$0x3]  }
  0x16   :  { %60 = vrot.lane.b32.xlu0 %v59_v7, %s359_s13  ;;  %v115_v14 = vld [vmem:[#allocation0] sm:$0x3]  }
  0x17   :  { %68 = vrot.lane.b32.xlu1 %v67_v8, %s360_s14  ;;  %v123_v15 = vld [vmem:[#allocation0] sm:$0x3]  }
  0x18   :  { %v131_v16 = vld [vmem:[#allocation0] sm:$0x3]  }
  0x19   :  { %v139_v17 = vld [vmem:[#allocation0] sm:$0x3]  }
  0x1a   :  { %76 = vrot.lane.b32.xlu0 %v75_v9, %s361_s15  ;;  %v147_v18 = vld [vmem:[#allocation0] sm:$0x3]  }
  0x1b   :  { %84 = vrot.lane.b32.xlu1 %v83_v10, %s362_s16  ;;  %v155_v19 = vld [vmem:[#allocation0] sm:$0x3]  }
  0x1c   :  { %v163_v20 = vld [vmem:[#allocation0] sm:$0x3]  }
  0x1d   :  { %v171_v21 = vld [vmem:[#allocation0] sm:$0x3]  }
  0x1e   :  { %92 = vrot.lane.b32.xlu0 %v91_v11, %s363_s17  ;;  %v179_v22 = vld [vmem:[#allocation0] sm:$0x3]  }
  0x1f   :  { %100 = vrot.lane.b32.xlu1 %v99_v12, %s364_s18  ;;  %v187_v23 = vld [vmem:[#allocation0] sm:$0x3]  }
  0x20   :  { %v195_v24 = vld [vmem:[#allocation0] sm:$0x3]  }
  0x21   :  { %v203_v25 = vld [vmem:[#allocation0] sm:$0x3]  }
  0x22   :  { %108 = vrot.lane.b32.xlu0 %v107_v13, %s365_s19  ;;  %v211_v26 = vld [vmem:[#allocation0] sm:$0x3]  }
  0x23   :  { %116 = vrot.lane.b32.xlu1 %v115_v14, %s366_s20  ;;  %v6_v27 = vld [vmem:[#allocation0] sm:$0x3]  }
  0x24   :  { %8 = vst.msk [vmem:[%s654_s1] sm:$0x1] %vm7_vm0, %v6_v27   ;;  %259 = vst.msk [vmem:[%s654_s1 + $0x1f] sm:$0x2] %vm7_vm0, %v6_v27   ;;  %v219_v28 = vld [vmem:[#allocation0] sm:$0x3]  }
  0x25   :  { %v227_v29 = vld [vmem:[#allocation0] sm:$0x3]  }
  0x26   :  { %124 = vrot.lane.b32.xlu0 %v123_v15, %s367_s21  ;;  %v235_v30 = vld [vmem:[#allocation0] sm:$0x3]  }
  0x27   :  { %132 = vrot.lane.b32.xlu1 %v131_v16, %s368_s22  ;;  %v243_v31 = vld [vmem:[#allocation0] sm:$0x3]  }
  0x28   :  { %v251_v32 = vld [vmem:[#allocation0] sm:$0x3]  }
  0x2a   :  { %140 = vrot.lane.b32.xlu0 %v139_v17, %s369_s23 }
  0x2b   :  { %148 = vrot.lane.b32.xlu1 %v147_v18, %s370_s24 }
  0x2e   :  { %156 = vrot.lane.b32.xlu0 %v155_v19, %s371_s25 }
  0x2f   :  { %164 = vrot.lane.b32.xlu1 %v163_v20, %s372_s26 }
  0x32   :  { %172 = vrot.lane.b32.xlu0 %v171_v21, %s373_s27 }
  0x33   :  { %180 = vrot.lane.b32.xlu1 %v179_v22, %s374_s28 }
  0x36   :  { %188 = vrot.lane.b32.xlu0 %v187_v23, %s375_s29 }
  0x37   :  { %196 = vrot.lane.b32.xlu1 %v195_v24, %s376_s30 }
  0x3a   :  { %204 = vrot.lane.b32.xlu0 %v203_v25, %s377_s6 }
  0x3b   :  { %212 = vrot.lane.b32.xlu1 %v211_v26, %s378_s7 }
  0x3e   :  { %220 = vrot.lane.b32.xlu0 %v219_v28, %s379_s0 }
  0x3f   :  { %228 = vrot.lane.b32.xlu1 %v227_v29, %s380_s8 }
  0x42   :  { %236 = vrot.lane.b32.xlu0 %v235_v30, %s381_s9 }
  0x43   :  { %244 = vrot.lane.b32.xlu1 %v243_v31, %s382_s10 }
  0x46   :  { %252 = vrot.lane.b32.xlu0 %v251_v32, %s383_s11 }
  0x7c   :  { %v13_v33 = vpop.permute.xlu0 %12  }
  0x7d   :  { %v29_v34 = vpop.permute.xlu1 %28   ;;  %260 = vst.msk [vmem:[%s654_s1 + $0x1] sm:$0x1] %vm7_vm0, %v13_v33   ;;  %261 = vst.msk [vmem:[%s654_s1 + $0x20] sm:$0x2] %vm7_vm0, %v13_v33  }
  0x7e   :  { %264 = vst.msk [vmem:[%s654_s1 + $0x3] sm:$0x1] %vm7_vm0, %v29_v34   ;;  %265 = vst.msk [vmem:[%s654_s1 + $0x22] sm:$0x2] %vm7_vm0, %v29_v34  }
  0x80   :  { %v21_v35 = vpop.permute.xlu0 %20  }
  0x81   :  { %v37_v36 = vpop.permute.xlu1 %36   ;;  %262 = vst.msk [vmem:[%s654_s1 + $0x2] sm:$0x1] %vm7_vm0, %v21_v35   ;;  %263 = vst.msk [vmem:[%s654_s1 + $0x21] sm:$0x2] %vm7_vm0, %v21_v35  }
  0x82   :  { %266 = vst.msk [vmem:[%s654_s1 + $0x4] sm:$0x1] %vm7_vm0, %v37_v36   ;;  %267 = vst.msk [vmem:[%s654_s1 + $0x23] sm:$0x2] %vm7_vm0, %v37_v36  }
  0x84   :  { %v45_v37 = vpop.permute.xlu0 %44  }
  0x85   :  { %v53_v38 = vpop.permute.xlu1 %52   ;;  %268 = vst.msk [vmem:[%s654_s1 + $0x5] sm:$0x1] %vm7_vm0, %v45_v37   ;;  %269 = vst.msk [vmem:[%s654_s1 + $0x24] sm:$0x2] %vm7_vm0, %v45_v37  }
  0x86   :  { %270 = vst.msk [vmem:[%s654_s1 + $0x6] sm:$0x1] %vm7_vm0, %v53_v38   ;;  %271 = vst.msk [vmem:[%s654_s1 + $0x25] sm:$0x2] %vm7_vm0, %v53_v38  }
  0x88   :  { %v61_v39 = vpop.permute.xlu0 %60  }
  0x89   :  { %v69_v40 = vpop.permute.xlu1 %68   ;;  %272 = vst.msk [vmem:[%s654_s1 + $0x7] sm:$0x1] %vm7_vm0, %v61_v39   ;;  %273 = vst.msk [vmem:[%s654_s1 + $0x26] sm:$0x2] %vm7_vm0, %v61_v39  }
  0x8a   :  { %274 = vst.msk [vmem:[%s654_s1 + $0x8] sm:$0x1] %vm7_vm0, %v69_v40   ;;  %275 = vst.msk [vmem:[%s654_s1 + $0x27] sm:$0x2] %vm7_vm0, %v69_v40  }
  0x8c   :  { %v77_v41 = vpop.permute.xlu0 %76  }
  0x8d   :  { %v85_v42 = vpop.permute.xlu1 %84   ;;  %276 = vst.msk [vmem:[%s654_s1 + $0x9] sm:$0x1] %vm7_vm0, %v77_v41   ;;  %277 = vst.msk [vmem:[%s654_s1 + $0x28] sm:$0x2] %vm7_vm0, %v77_v41  }
  0x8e   :  { %278 = vst.msk [vmem:[%s654_s1 + $0xa] sm:$0x1] %vm7_vm0, %v85_v42   ;;  %279 = vst.msk [vmem:[%s654_s1 + $0x29] sm:$0x2] %vm7_vm0, %v85_v42  }
  0x90   :  { %v93_v43 = vpop.permute.xlu0 %92  }
  0x91   :  { %v101_v44 = vpop.permute.xlu1 %100   ;;  %280 = vst.msk [vmem:[%s654_s1 + $0xb] sm:$0x1] %vm7_vm0, %v93_v43   ;;  %281 = vst.msk [vmem:[%s654_s1 + $0x2a] sm:$0x2] %vm7_vm0, %v93_v43  }
  0x92   :  { %282 = vst.msk [vmem:[%s654_s1 + $0xc] sm:$0x1] %vm7_vm0, %v101_v44   ;;  %283 = vst.msk [vmem:[%s654_s1 + $0x2b] sm:$0x2] %vm7_vm0, %v101_v44  }
  0x94   :  { %v109_v45 = vpop.permute.xlu0 %108  }
  0x95   :  { %v117_v46 = vpop.permute.xlu1 %116   ;;  %284 = vst.msk [vmem:[%s654_s1 + $0xd] sm:$0x1] %vm7_vm0, %v109_v45   ;;  %285 = vst.msk [vmem:[%s654_s1 + $0x2c] sm:$0x2] %vm7_vm0, %v109_v45  }
  0x96   :  { %286 = vst.msk [vmem:[%s654_s1 + $0xe] sm:$0x1] %vm7_vm0, %v117_v46   ;;  %287 = vst.msk [vmem:[%s654_s1 + $0x2d] sm:$0x2] %vm7_vm0, %v117_v46  }
  0x98   :  { %v125_v47 = vpop.permute.xlu0 %124  }
  0x99   :  { %v133_v48 = vpop.permute.xlu1 %132   ;;  %288 = vst.msk [vmem:[%s654_s1 + $0xf] sm:$0x1] %vm7_vm0, %v125_v47   ;;  %289 = vst.msk [vmem:[%s654_s1 + $0x2e] sm:$0x2] %vm7_vm0, %v125_v47  }
  0x9a   :  { %290 = vst.msk [vmem:[%s654_s1 + $0x10] sm:$0x1] %vm7_vm0, %v133_v48   ;;  %291 = vst.msk [vmem:[%s654_s1 + $0x2f] sm:$0x2] %vm7_vm0, %v133_v48  }
  0x9c   :  { %v141_v49 = vpop.permute.xlu0 %140  }
  0x9d   :  { %v149_v50 = vpop.permute.xlu1 %148   ;;  %292 = vst.msk [vmem:[%s654_s1 + $0x11] sm:$0x1] %vm7_vm0, %v141_v49   ;;  %293 = vst.msk [vmem:[%s654_s1 + $0x30] sm:$0x2] %vm7_vm0, %v141_v49  }
  0x9e   :  { %294 = vst.msk [vmem:[%s654_s1 + $0x12] sm:$0x1] %vm7_vm0, %v149_v50   ;;  %295 = vst.msk [vmem:[%s654_s1 + $0x31] sm:$0x2] %vm7_vm0, %v149_v50  }
  0xa0   :  { %v157_v51 = vpop.permute.xlu0 %156  }
  0xa1   :  { %v165_v52 = vpop.permute.xlu1 %164   ;;  %296 = vst.msk [vmem:[%s654_s1 + $0x13] sm:$0x1] %vm7_vm0, %v157_v51   ;;  %297 = vst.msk [vmem:[%s654_s1 + $0x32] sm:$0x2] %vm7_vm0, %v157_v51  }
  0xa2   :  { %298 = vst.msk [vmem:[%s654_s1 + $0x14] sm:$0x1] %vm7_vm0, %v165_v52   ;;  %299 = vst.msk [vmem:[%s654_s1 + $0x33] sm:$0x2] %vm7_vm0, %v165_v52  }
  0xa4   :  { %v173_v53 = vpop.permute.xlu0 %172  }
  0xa5   :  { %v181_v54 = vpop.permute.xlu1 %180   ;;  %300 = vst.msk [vmem:[%s654_s1 + $0x15] sm:$0x1] %vm7_vm0, %v173_v53   ;;  %301 = vst.msk [vmem:[%s654_s1 + $0x34] sm:$0x2] %vm7_vm0, %v173_v53  }
  0xa6   :  { %302 = vst.msk [vmem:[%s654_s1 + $0x16] sm:$0x1] %vm7_vm0, %v181_v54   ;;  %303 = vst.msk [vmem:[%s654_s1 + $0x35] sm:$0x2] %vm7_vm0, %v181_v54  }
  0xa8   :  { %v189_v55 = vpop.permute.xlu0 %188  }
  0xa9   :  { %v197_v56 = vpop.permute.xlu1 %196   ;;  %304 = vst.msk [vmem:[%s654_s1 + $0x17] sm:$0x1] %vm7_vm0, %v189_v55   ;;  %305 = vst.msk [vmem:[%s654_s1 + $0x36] sm:$0x2] %vm7_vm0, %v189_v55  }
  0xaa   :  { %306 = vst.msk [vmem:[%s654_s1 + $0x18] sm:$0x1] %vm7_vm0, %v197_v56   ;;  %307 = vst.msk [vmem:[%s654_s1 + $0x37] sm:$0x2] %vm7_vm0, %v197_v56  }
  0xac   :  { %v205_v57 = vpop.permute.xlu0 %204  }
  0xad   :  { %v213_v58 = vpop.permute.xlu1 %212   ;;  %308 = vst.msk [vmem:[%s654_s1 + $0x19] sm:$0x1] %vm7_vm0, %v205_v57   ;;  %309 = vst.msk [vmem:[%s654_s1 + $0x38] sm:$0x2] %vm7_vm0, %v205_v57  }
  0xae   :  { %310 = vst.msk [vmem:[%s654_s1 + $0x1a] sm:$0x1] %vm7_vm0, %v213_v58   ;;  %311 = vst.msk [vmem:[%s654_s1 + $0x39] sm:$0x2] %vm7_vm0, %v213_v58  }
  0xb0   :  { %v221_v59 = vpop.permute.xlu0 %220  }
  0xb1   :  { %v229_v60 = vpop.permute.xlu1 %228   ;;  %312 = vst.msk [vmem:[%s654_s1 + $0x1b] sm:$0x1] %vm7_vm0, %v221_v59   ;;  %313 = vst.msk [vmem:[%s654_s1 + $0x3a] sm:$0x2] %vm7_vm0, %v221_v59  }
  0xb2   :  { %314 = vst.msk [vmem:[%s654_s1 + $0x1c] sm:$0x1] %vm7_vm0, %v229_v60   ;;  %315 = vst.msk [vmem:[%s654_s1 + $0x3b] sm:$0x2] %vm7_vm0, %v229_v60  }
  0xb4   :  { %v237_v61 = vpop.permute.xlu0 %236  }
  0xb5   :  { %v245_v62 = vpop.permute.xlu1 %244   ;;  %316 = vst.msk [vmem:[%s654_s1 + $0x1d] sm:$0x1] %vm7_vm0, %v237_v61   ;;  %317 = vst.msk [vmem:[%s654_s1 + $0x3c] sm:$0x2] %vm7_vm0, %v237_v61  }
  0xb6   :  { %318 = vst.msk [vmem:[%s654_s1 + $0x1e] sm:$0x1] %vm7_vm0, %v245_v62   ;;  %319 = vst.msk [vmem:[%s654_s1 + $0x3d] sm:$0x2] %vm7_vm0, %v245_v62  }
  0xb8   :  { %v253_v63 = vpop.permute.xlu0 %252  }
  0xb9   :  { %320 = vst.msk [vmem:[%s654_s1 + $0x1f] sm:$0x1] %vm7_vm0, %v253_v63   ;;  %321 = vst.msk [vmem:[%s654_s1 + $0x3e] sm:$0x2] %vm7_vm0, %v253_v63  }

// kernel: _lambda_.1
= control target key start
LH: loop header
LB: loop body
LE: loop exit
PB: predicated region body
PF: predicated region fallthrough
CT: control target
= control target key end

     0   :  { %v588_v0 = vmov 0.0   ;;  %vm589_vm0 = vmmov 0   ;;  %vm206_vm1 = vcmask 64512   ;;  %v590_v11 = vmov 0   ;;  %s757_s1 = inlined_call_operand.vmem [shape: bf16[128,128], index: 1, kind: input, shape index: {}]   ;;  %s758_s0 = inlined_call_operand.vmem [shape: bf16[8,128], index: 0, kind: input, shape index: {}]   ;;  %s759_s2 = inlined_call_operand.vmem [shape: bf16[64,8], index: 2, kind: input, shape index: {}]   ;;  %s760_s3 = inlined_call_operand.vmem [shape: f32[64,1], index: 3, kind: input, shape index: {}]   ;;  %s761_s5 = inlined_call_operand.vmem [shape: f32[64,1], index: 5, kind: input, shape index: {}]   ;;  %s762_s4 = inlined_call_operand.vmem [shape: bf16[64,64], index: 4, kind: input, shape index: {}]   ;;  %s763_s6 = inlined_call_operand.vmem [shape: f32[64,128], index: 6, kind: output, shape index: {}]  }
   0x1   :  { %520 = vmatprep.subr.bf16.mxu0 %v588_v0  ;;  %v572_v1 = vld [vmem:[%s757_s1] sm:$0xff]   ;;  %536 = vmatprep.mubr.msk.bf16.mxu0 %vm589_vm0, %v588_v0  ;;  %v573_v2 = vld [vmem:[%s757_s1 + $0x8] sm:$0xff]   ;;  %v574_v3 = vld [vmem:[%s757_s1 + $0x10] sm:$0xff]   ;;  %vm219_vm2 = vcmask 1043456   ;;  %vm376_vm3 = vcmask 523264  }
   0x2   :  { %521 = vmatpush3.bf16.msra.mxu0 %v572_v1  ;;  %v575_v4 = vld [vmem:[%s757_s1 + $0x18] sm:$0xff]   ;;  %v576_v5 = vld [vmem:[%s757_s1 + $0x20] sm:$0xff]   ;;  %v577_v6 = vld [vmem:[%s757_s1 + $0x28] sm:$0xff]   ;;  %570 = vset.pattern.permute.xlu0 %v590_v11 }
   0x3   :  { %522 = vmatprep.subr.bf16.mxu0 %v588_v0  ;;  %v578_v7 = vld [vmem:[%s757_s1 + $0x30] sm:$0xff]   ;;  %v579_v8 = vld [vmem:[%s757_s1 + $0x38] sm:$0xff]   ;;  %v24_v9 = vld [vmem:[%s758_s0] sm:$0xf]  ;;  %571 = vset.pattern.permute.xlu1 %v590_v11 }
   0x4   :  { %v580_v10 = vld [vmem:[%s759_s2] sm:$0xff]   ;;  %v140_v13 = vld [vmem:[%s760_s3 + $0x10] sm:$0xff]  ;;  %v139_v14 = vld [vmem:[%s760_s3 + $0x8] sm:$0xff] }
   0x5   :  { %542 = vmatprep.mubr.msk.bf16.mxu1 %vm206_vm1, %v580_v10  ;;  %v138_v12 = vld [vmem:[%s760_s3] sm:$0xff]  ;;  %158 = vperm.xlu1 %571, %v140_v13   ;;  %v141_v15 = vld [vmem:[%s760_s3 + $0x18] sm:$0xff]  ;;  %v143_v17 = vld [vmem:[%s760_s3 + $0x28] sm:$0xff] }
   0x6   :  { %523 = vmatpush3.bf16.msra.mxu0 %v573_v2  ;;  %148 = vperm.xlu0 %570, %v138_v12   ;;  %v142_v16 = vld [vmem:[%s760_s3 + $0x20] sm:$0xff]  ;;  %v144_v18 = vld [vmem:[%s760_s3 + $0x30] sm:$0xff]  ;;  %v145_v19 = vld [vmem:[%s760_s3 + $0x38] sm:$0xff] }
   0x7   :  { %524 = vmatprep.subr.bf16.mxu0 %v588_v0  ;;  %v308_v20 = vld [vmem:[%s761_s5] sm:$0xff]  ;;  %v309_v21 = vld [vmem:[%s761_s5 + $0x8] sm:$0xff]  ;;  %v310_v22 = vld [vmem:[%s761_s5 + $0x10] sm:$0xff] }
   0x8   :  { %v311_v23 = vld [vmem:[%s761_s5 + $0x18] sm:$0xff]  ;;  %v312_v24 = vld [vmem:[%s761_s5 + $0x20] sm:$0xff]  ;;  %v313_v25 = vld [vmem:[%s761_s5 + $0x28] sm:$0xff] }
   0x9   :  { %163 = vperm.xlu1 %571, %v141_v15   ;;  %v314_v26 = vld [vmem:[%s761_s5 + $0x30] sm:$0xff]  ;;  %v315_v27 = vld [vmem:[%s761_s5 + $0x38] sm:$0xff]  ;;  %v581_v34 = vld [vmem:[%s759_s2 + $0x8] sm:$0xff]  }
   0xa   :  { %525 = vmatpush3.bf16.msra.mxu0 %v574_v3  ;;  %153 = vperm.xlu0 %570, %v139_v14   ;;  %v582_v35 = vld [vmem:[%s759_s2 + $0x10] sm:$0xff]   ;;  %v583_v36 = vld [vmem:[%s759_s2 + $0x18] sm:$0xff]   ;;  %v584_v37 = vld [vmem:[%s762_s4] sm:$0xff]  }
   0xb   :  { %526 = vmatprep.subr.bf16.mxu0 %v588_v0  ;;  %v585_v10 = vld [vmem:[%s762_s4 + $0x8] sm:$0xff]   ;;  %v586_v11 = vld [vmem:[%s762_s4 + $0x10] sm:$0xff]   ;;  %v587_v12 = vld [vmem:[%s762_s4 + $0x18] sm:$0xff]  }
   0xd   :  { %173 = vperm.xlu1 %571, %v143_v17  }
   0xe   :  { %527 = vmatpush3.bf16.msra.mxu0 %v575_v4  ;;  %168 = vperm.xlu0 %570, %v142_v16  }
   0xf   :  { %528 = vmatprep.subr.bf16.mxu0 %v588_v0 }
  0x11   :  { %183 = vperm.xlu1 %571, %v145_v19  }
  0x12   :  { %529 = vmatpush3.bf16.msra.mxu0 %v576_v5  ;;  %178 = vperm.xlu0 %570, %v144_v18  }
  0x13   :  { %530 = vmatprep.subr.bf16.mxu0 %v588_v0 }
  0x15   :  { %323 = vperm.xlu1 %571, %v309_v21  }
  0x16   :  { %531 = vmatpush3.bf16.msra.mxu0 %v577_v6  ;;  %318 = vperm.xlu0 %570, %v308_v20  }
  0x17   :  { %532 = vmatprep.subr.bf16.mxu0 %v588_v0 }
  0x19   :  { %333 = vperm.xlu1 %571, %v311_v23  }
  0x1a   :  { %533 = vmatpush3.bf16.msra.mxu0 %v578_v7  ;;  %328 = vperm.xlu0 %570, %v310_v22  }
  0x1b   :  { %534 = vmatprep.subr.bf16.mxu0 %v588_v0 }
  0x1d   :  { %343 = vperm.xlu1 %571, %v313_v25  }
  0x1e   :  { %535 = vmatpush3.bf16.msra.mxu0 %v579_v8  ;;  %338 = vperm.xlu0 %570, %v312_v24  }
  0x21   :  { %537 = vmatmul.mubr.bf16.vlgmr.msra.gmra.mrb[0].mxu0 %v24_v9  ;;  %353 = vperm.xlu1 %571, %v315_v27  }
  0x22   :  { %348 = vperm.xlu0 %570, %v314_v26  }
  0x84   :  { %v159_v39 = vpop.permute.xlu1 %158 }
  0x85   :  { %v149_v38 = vpop.permute.xlu0 %148 }
  0x88   :  { %v164_v41 = vpop.permute.xlu1 %163 }
  0x89   :  { %v154_v40 = vpop.permute.xlu0 %153 }
  0x8c   :  { %v174_v50 = vpop.permute.xlu1 %173 }
  0x8d   :  { %v169_v45 = vpop.permute.xlu0 %168 }
  0x90   :  { %v184_v62 = vpop.permute.xlu1 %183 }
  0x91   :  { %v179_v57 = vpop.permute.xlu0 %178 }
  0x94   :  { %v324_v14 = vpop.permute.xlu1 %323 }
  0x95   :  { %v319_v13 = vpop.permute.xlu0 %318 }
  0x98   :  { %v334_v16 = vpop.permute.xlu1 %333 }
  0x99   :  { %v329_v15 = vpop.permute.xlu0 %328 }
  0x9c   :  { %v344_v26 = vpop.permute.xlu1 %343 }
  0x9d   :  { %v339_v20 = vpop.permute.xlu0 %338 }
  0xf4   :  { %v123_v28 = vpop.f32.mrb[0].mxu0 }
  0xf5   :  { %v137_v29 = vpack.c.bf16 %v123_v28, %v123_v28  ;;  %v538_v30 = vpop.f32.mrb[1].mxu0 }
  0xf6   :  { %v126_v31 = vpop.f32.mrb[2].mxu0 }
  0xf7   :  { %v539_v32 = vpop.f32.mrb[3].mxu0  ;;  %566 = vmatprep.subr.msk.bf16.mxu1 %vm219_vm2, %v137_v29  ;;  %v221_v33 = vsel %vm219_vm2, %v137_v29, 0  ;;  %v349_v31 = vpop.permute.xlu0 %348 }
  0xf8   :  { %541 = vmatpush3.bf16.msra.mxu1 %v221_v33 }
  0xfb   :  { %543 = vmatmul.mubr.msk.bf16.vlgmr.msra.gmra.mrb[0].mxu1 %vm206_vm1, %v581_v34 }
  0xfc   :  { %546 = vmatprep.mubr.msk.bf16.mxu1 %vm206_vm1, %v582_v35  ;;  %v354_v35 = vpop.permute.xlu1 %353 }
 0x103   :  { %547 = vmatmul.mubr.msk.bf16.gmra.mrb[4].mxu1 %vm206_vm1, %v583_v36 }
 0x104   :  { %558 = vmatprep.mubr.msk.bf16.mxu1 %vm376_vm3, %v584_v37 }
 0x1ce   :  { %v544_v42 = vpop.f32.mrb[0].mxu1 }
 0x1cf   :  { %v266_v43 = vadd.f32 %v544_v42, %v159_v39  ;;  %v257_v44 = vpop.f32.mrb[1].mxu1 }
 0x1d0   :  { %v258_v46 = vadd.f32 %v257_v44, %v149_v38  ;;  %v545_v47 = vpop.f32.mrb[2].mxu1 }
 0x1d1   :  { %v269_v48 = vadd.f32 %v545_v47, %v164_v41  ;;  %v260_v49 = vpop.f32.mrb[3].mxu1  ;;  %v290_v52 = vmax.f32 %v266_v43, 0.0 }
 0x1d2   :  { %v261_v51 = vadd.f32 %v260_v49, %v154_v40  ;;  %v288_v54 = vmax.f32 %v258_v46, 0.0 }
 0x1d3   :  { %v291_v53 = vmax.f32 %v269_v48, 0.0 }
 0x1d4   :  { %v289_v55 = vmax.f32 %v261_v51, 0.0 }
 0x1d5   :  { %v305_v56 = vpack.c.bf16 %v291_v53, %v290_v52 }
 0x1d6   :  { %v304_v58 = vpack.c.bf16 %v289_v55, %v288_v54  ;;  %v548_v59 = vpop.f32.mrb[4].mxu1 }
 0x1d7   :  { %v282_v60 = vadd.f32 %v548_v59, %v179_v57  ;;  %v273_v61 = vpop.f32.mrb[5].mxu1 }
 0x1d8   :  { %v274_v63 = vadd.f32 %v273_v61, %v169_v45  ;;  %v549_v0 = vpop.f32.mrb[6].mxu1  ;;  %550 = vmatprep.subr.bf16.mxu1 %v304_v58 }
 0x1d9   :  { %v285_v1 = vadd.f32 %v549_v0, %v184_v62  ;;  %v276_v2 = vpop.f32.mrb[7].mxu1  ;;  %551 = vmatpush3.bf16.msra.mxu1 %v304_v58  ;;  %v294_v4 = vmax.f32 %v282_v60, 0.0 }
 0x1da   :  { %v277_v3 = vadd.f32 %v276_v2, %v174_v50  ;;  %552 = vmatprep.subr.bf16.mxu1 %v305_v56  ;;  %v292_v6 = vmax.f32 %v274_v63, 0.0 }
 0x1db   :  { %v295_v5 = vmax.f32 %v285_v1, 0.0 }
 0x1dc   :  { %v293_v7 = vmax.f32 %v277_v3, 0.0 }
 0x1dd   :  { %v307_v8 = vpack.c.bf16 %v295_v5, %v294_v4  ;;  %553 = vmatpush3.bf16.msra.mxu1 %v305_v56 }
 0x1de   :  { %v306_v9 = vpack.c.bf16 %v293_v7, %v292_v6 }
 0x1e0   :  { %554 = vmatprep.subr.bf16.mxu1 %v306_v9 }
 0x1e1   :  { %555 = vmatpush3.bf16.msra.mxu1 %v306_v9 }
 0x1e2   :  { %556 = vmatprep.subr.bf16.mxu1 %v307_v8 }
 0x1e5   :  { %557 = vmatpush3.bf16.msra.mxu1 %v307_v8 }
 0x1e8   :  { %559 = vmatmul.mubr.msk.bf16.vlgmr.msra.gmra.mrb[8].mxu1 %vm376_vm3, %v585_v10 }
 0x1e9   :  { %562 = vmatprep.mubr.msk.bf16.mxu1 %vm376_vm3, %v586_v11 }
 0x1f0   :  { %563 = vmatmul.mubr.msk.bf16.gmra.mrb[12].mxu1 %vm376_vm3, %v587_v12 }
 0x2bb   :  { %v560_v17 = vpop.f32.mrb[8].mxu1 }
 0x2bc   :  { %v432_v18 = vadd.f32 %v560_v17, %v329_v15  ;;  %v423_v19 = vpop.f32.mrb[9].mxu1 }
 0x2bd   :  { %v424_v21 = vadd.f32 %v423_v19, %v319_v13  ;;  %v561_v22 = vpop.f32.mrb[10].mxu1 }
 0x2be   :  { %v456_v23 = vmax.f32 %v432_v18, 0.0  ;;  %v435_v24 = vadd.f32 %v561_v22, %v334_v16  ;;  %v426_v25 = vpop.f32.mrb[11].mxu1 }
 0x2bf   :  { %v454_v27 = vmax.f32 %v424_v21, 0.0  ;;  %v427_v28 = vadd.f32 %v426_v25, %v324_v14 }
 0x2c0   :  { %464 = vst [vmem:[%s763_s6 + $0x10] sm:$0xff] %v456_v23  ;;  %v457_v29 = vmax.f32 %v435_v24, 0.0 }
 0x2c1   :  { %462 = vst [vmem:[%s763_s6] sm:$0xff] %v454_v27  ;;  %v455_v30 = vmax.f32 %v427_v28, 0.0 }
 0x2c2   :  { %465 = vst [vmem:[%s763_s6 + $0x18] sm:$0xff] %v457_v29 }
 0x2c3   :  { %463 = vst [vmem:[%s763_s6 + $0x8] sm:$0xff] %v455_v30  ;;  %v564_v32 = vpop.f32.mrb[12].mxu1 }
 0x2c4   :  { %v448_v33 = vadd.f32 %v564_v32, %v349_v31  ;;  %v439_v34 = vpop.f32.mrb[13].mxu1 }
 0x2c5   :  { %v440_v36 = vadd.f32 %v439_v34, %v339_v20  ;;  %v565_v37 = vpop.f32.mrb[14].mxu1 }
 0x2c6   :  { %v460_v38 = vmax.f32 %v448_v33, 0.0  ;;  %v451_v39 = vadd.f32 %v565_v37, %v354_v35  ;;  %v442_v40 = vpop.f32.mrb[15].mxu1 }
 0x2c7   :  { %v458_v41 = vmax.f32 %v440_v36, 0.0  ;;  %v443_v42 = vadd.f32 %v442_v40, %v344_v26 }
 0x2c8   :  { %468 = vst [vmem:[%s763_s6 + $0x30] sm:$0xff] %v460_v38  ;;  %v461_v43 = vmax.f32 %v451_v39, 0.0 }
 0x2c9   :  { %466 = vst [vmem:[%s763_s6 + $0x20] sm:$0xff] %v458_v41  ;;  %v459_v44 = vmax.f32 %v443_v42, 0.0 }
 0x2ca   :  { %469 = vst [vmem:[%s763_s6 + $0x38] sm:$0xff] %v461_v43 }
 0x2cb   :  { %467 = vst [vmem:[%s763_s6 + $0x28] sm:$0xff] %v459_v44 }

</bundles_post_ra>
